<compile_context>
chip_gen: v5e
topology: v5e:2x2
jax: 0.10.0
libtpu: 0.0.40
codegen_flags: <defaults>
</compile_context>

<pallas_src>
import math
import functools

import jax
import jax.numpy as jnp
from jax import lax
from jax.experimental import pallas as pl
from jax.experimental.pallas import tpu as pltpu


def _round_up(x, m):
    return ((x + m - 1) // m) * m


# ----------------------------------------------------------------------------
# Pallas kernel 1: tiled matmul + per-column scale/shift (+ optional ReLU)
#   used for conv (im2col) + folded BatchNorm(eval) + ReLU and for the hoisted
#   GRU input projection (scale=1, shift=b_ih, no ReLU).
# ----------------------------------------------------------------------------
def _matmul_scale_shift_kernel(relu, x_ref, w_ref, scale_ref, shift_ref, o_ref):
    acc = jnp.dot(x_ref[...], w_ref[...], preferred_element_type=jnp.float32)
    y = acc * scale_ref[...] + shift_ref[...]
    if relu:
        y = jnp.maximum(y, 0.0)
    o_ref[...] = y


def matmul_scale_shift(x, w, scale, shift, *, relu, tm=512):
    m, k = x.shape
    nout = w.shape[1]
    tm = min(tm, _round_up(m, 8))          # tile rows; keep a multiple of 8 sublanes
    mp = _round_up(m, tm)
    if mp != m:
        x = jnp.pad(x, ((0, mp - m), (0, 0)))
    out = pl.pallas_call(
        functools.partial(_matmul_scale_shift_kernel, relu),
        out_shape=jax.ShapeDtypeStruct((mp, nout), jnp.float32),
        grid=(mp // tm,),
        in_specs=[
            pl.BlockSpec((tm, k), lambda i: (i, 0)),
            pl.BlockSpec((k, nout), lambda i: (0, 0)),
            pl.BlockSpec((1, nout), lambda i: (0, 0)),
            pl.BlockSpec((1, nout), lambda i: (0, 0)),
        ],
        out_specs=pl.BlockSpec((tm, nout), lambda i: (i, 0)),
        compiler_params=pltpu.CompilerParams(
            dimension_semantics=("parallel",),
            # TM=512, K<=1152 f32: ~(2.4MB in + 0.3MB out) x 2 buffers + weights < 8 MiB,
            # safely inside v7x's 64 MiB physical VMEM with headroom.
            vmem_limit_bytes=32 * 1024 * 1024,
        ),
    )(x, w, scale.reshape(1, nout), shift.reshape(1, nout))
    return out[:m] if mp != m else out


def im2col_stride_w2(x_nhwc):
    """3x3 conv, stride (1,2), padding (1,1): extract patches (glue, plain JAX)."""
    # TODO(synk): move patch extraction into the Pallas kernel (per-tile row-window DMA +
    # 9 accumulated taps) to remove the ~9x im2col HBM traffic of the mem-bound conv stack.
    n, h, w, c = x_nhwc.shape
    w_out = (w - 1) // 2 + 1
    xp = jnp.pad(x_nhwc, ((0, 0), (1, 1), (1, 1), (0, 0)))
    cols = []
    for kh in range(3):
        for kw in range(3):
            cols.append(xp[:, kh:kh + h, kw:kw + 2 * w_out:2, :])
    patches = jnp.concatenate(cols, axis=-1)  # [N, H, W_out, 9*C]
    return patches.reshape(n * h * w_out, 9 * c), (n, h, w_out)


# ----------------------------------------------------------------------------
# Pallas kernel 2: GRU recurrence (PyTorch gate semantics), CT timesteps per
# grid step, hidden state carried in VMEM scratch. Input projection is hoisted.
# ----------------------------------------------------------------------------
def _gru_recurrence_kernel(gi_ref, whh_ref, bhh_ref, mem_ref, h_ref):
    ct = mem_ref.shape[0]
    hd = whh_ref.shape[0]

    @pl.when(pl.program_id(0) == 0)
    def _():
        h_ref[...] = jnp.zeros_like(h_ref)

    def step(s, carry):
        gi = gi_ref[s]                      # [N, 3H] (already includes x@W_ih + b_ih)
        h = h_ref[...]                      # [N, H]
        gh = jnp.dot(h, whh_ref[...], preferred_element_type=jnp.float32) + bhh_ref[...]
        r = jax.nn.sigmoid(gi[:, 0 * hd:1 * hd] + gh[:, 0 * hd:1 * hd])
        z = jax.nn.sigmoid(gi[:, 1 * hd:2 * hd] + gh[:, 1 * hd:2 * hd])
        n = jnp.tanh(gi[:, 2 * hd:3 * hd] + r * gh[:, 2 * hd:3 * hd])
        h_new = (1.0 - z) * n + z * h
        h_ref[...] = h_new
        mem_ref[s] = h_new
        return carry

    lax.fori_loop(0, ct, step, 0, unroll=True)


def gru_forward(x_ntd, w_ih, w_hh, b_ih, b_hh, *, ct=8):
    """x_ntd: [N, T, D] (batch_first). Returns memory [N, T, H]."""
    n, t, d = x_ntd.shape
    h3 = w_ih.shape[0]
    hd = h3 // 3

    # Hoisted input projection: one [N*T, D] x [D, 3H] matmul instead of T tiny dots.
    gi = matmul_scale_shift(x_ntd.reshape(n * t, d), w_ih.T,
                            jnp.ones((h3,), jnp.float32), b_ih, relu=False)
    gi = jnp.transpose(gi.reshape(n, t, h3), (1, 0, 2))      # time-major [T, N, 3H]

    ct = min(ct, t)
    tp = _round_up(t, ct)
    if tp != t:
        gi = jnp.pad(gi, ((0, tp - t), (0, 0), (0, 0)))      # extra steps sliced away

    mem = pl.pallas_call(
        _gru_recurrence_kernel,
        out_shape=jax.ShapeDtypeStruct((tp, n, hd), jnp.float32),
        grid=(tp // ct,),
        in_specs=[
            pl.BlockSpec((ct, n, h3), lambda i: (i, 0, 0)),
            pl.BlockSpec((hd, h3), lambda i: (0, 0)),
            pl.BlockSpec((1, h3), lambda i: (0, 0)),
        ],
        out_specs=pl.BlockSpec((ct, n, hd), lambda i: (i, 0, 0)),
        scratch_shapes=[pltpu.VMEM((n, hd), jnp.float32)],
        compiler_params=pltpu.CompilerParams(dimension_semantics=("arbitrary",)),
    )(gi, w_hh.T, b_hh.reshape(1, h3))
    if tp != t:
        mem = mem[:t]
    return jnp.transpose(mem, (1, 0, 2))                      # [N, T, H]


# ----------------------------------------------------------------------------
# Pallas kernel 3: bottleneck linear + scaled-dot-product attention + ReLU,
# processing a chunk of batch elements per grid step.
# ----------------------------------------------------------------------------
def _bottleneck_attn_kernel(split, inv_sqrt_dk,
                            mem_ref, text_ref, tmask_ref, mmask_ref,
                            wb_ref, bb_ref, wq_ref, wk_ref,
                            style_ref, align_ref):
    b, t, e = mem_ref.shape
    s = text_ref.shape[1]

    # Shared-weight projections as flattened 2-D matmuls (better MXU row occupancy).
    kv = jnp.dot(mem_ref[...].reshape(b * t, e), wb_ref[...],
                 preferred_element_type=jnp.float32) + bb_ref[...]      # [B*T, 2P]
    value = kv[:, split:].reshape(b, t, -1)                              # [B, T, P]
    q = jnp.dot(text_ref[...].reshape(b * s, -1), wq_ref[...],
                preferred_element_type=jnp.float32).reshape(b, s, -1)    # [B, S, A]
    k = jnp.dot(kv[:, :split], wk_ref[...],
                preferred_element_type=jnp.float32).reshape(b, t, -1)    # [B, T, A]

    align = jnp.einsum('bsa,bta->bst', q, k,
                       preferred_element_type=jnp.float32) * inv_sqrt_dk
    attn_mask = tmask_ref[...] * mmask_ref[...]        # [B,S,1]*[B,1,T] -> [B,S,T]
    align = jnp.where(attn_mask == 0.0, -1e9, align)   # matches score_mask_value=-1e9
    m = jnp.max(align, axis=-1, keepdims=True)
    ex = jnp.exp(align - m)
    w = ex * pl.reciprocal(jnp.sum(ex, axis=-1, keepdims=True), approx=True)
    ctx = jnp.einsum('bst,btp->bsp', w, value, preferred_element_type=jnp.float32)
    style_ref[...] = jnp.maximum(ctx, 0.0)
    align_ref[...] = w


def bottleneck_attention(memory, embedded_text, text_mask, mels_mask,
                         wb, bb, wq, wk, *, split, d_k):
    n, t, e = memory.shape
    _, s, eenc = embedded_text.shape
    p2 = wb.shape[0]
    a = wq.shape[0]
    vwidth = p2 - split

    # Batch chunking: amortize per-grid-step overhead while keeping >=2 parallel
    # grid steps for v7x megacore when N >= 2.
    b_blk = max(1, (n + 1) // 2)
    nb = (n + b_blk - 1) // b_blk
    npad = nb * b_blk
    if npad != n:
        pad = ((0, npad - n), (0, 0), (0, 0))
        memory = jnp.pad(memory, pad)
        embedded_text = jnp.pad(embedded_text, pad)
        text_mask = jnp.pad(text_mask, pad)
        mels_mask = jnp.pad(mels_mask, pad)

    kernel = functools.partial(_bottleneck_attn_kernel, split, 1.0 / math.sqrt(d_k))
    style, align = pl.pallas_call(
        kernel,
        out_shape=(jax.ShapeDtypeStruct((npad, s, vwidth), jnp.float32),
                   jax.ShapeDtypeStruct((npad, s, t), jnp.float32)),
        grid=(nb,),
        in_specs=[
            pl.BlockSpec((b_blk, t, e), lambda i: (i, 0, 0)),
            pl.BlockSpec((b_blk, s, eenc), lambda i: (i, 0, 0)),
            pl.BlockSpec((b_blk, s, 1), lambda i: (i, 0, 0)),
            pl.BlockSpec((b_blk, 1, t), lambda i: (i, 0, 0)),
            pl.BlockSpec((e, p2), lambda i: (0, 0)),
            pl.BlockSpec((1, p2), lambda i: (0, 0)),
            pl.BlockSpec((eenc, a), lambda i: (0, 0)),
            pl.BlockSpec((split, a), lambda i: (0, 0)),
        ],
        out_specs=(pl.BlockSpec((b_blk, s, vwidth), lambda i: (i, 0, 0)),
                   pl.BlockSpec((b_blk, s, t), lambda i: (i, 0, 0))),
        compiler_params=pltpu.CompilerParams(dimension_semantics=("parallel",)),
    )(memory, embedded_text, text_mask, mels_mask,
      wb.T, bb.reshape(1, p2), wq.T, wk.T)
    return style[:n], align[:n]


# ----------------------------------------------------------------------------
# Module (parameter setup + glue in plain JAX)
# ----------------------------------------------------------------------------
class FineGrainedReferenceEncoderPallas:
    def __init__(self, key, num_mel, embedding_dim, prosody_embedding_dim,
                 encoder_embedding_dim, fg_attention_dim):
        self.num_mel = num_mel
        self.embedding_dim = embedding_dim
        # NOTE: reproduces the original code's `self.prosody_embedding_dim = embedding_dim`
        self.prosody_embedding_dim = embedding_dim
        self.d_k = prosody_embedding_dim  # attention scaling uses the constructor arg
        self.eps = 1e-5

        filters = [1, 32, 32, 64, 64, 128, 128]
        n_layers = len(filters) - 1
        keys = jax.random.split(key, 4 * n_layers + 8)
        ki = iter(range(len(keys)))

        def normal(shape, scale):
            return jax.random.normal(keys[next(ki)], shape, jnp.float32) * scale

        # conv / BN parameters (PyTorch layout [Cout, Cin, kh, kw])
        self.conv_params = []
        for i in range(n_layers):
            cin = filters[i] + 3 if i == 0 else filters[i]   # CoordConv adds x, y, r
            cout = filters[i + 1]
            w = normal((cout, cin, 3, 3), 1.0 / math.sqrt(cin * 9))
            b = normal((cout,), 0.1)
            gamma = jnp.ones((cout,), jnp.float32)
            beta = jnp.zeros((cout,), jnp.float32)
            rmean = jnp.zeros((cout,), jnp.float32)
            rvar = jnp.ones((cout,), jnp.float32)
            self.conv_params.append((w, b, gamma, beta, rmean, rvar))

        # GRU parameters
        post_conv_height = num_mel
        for _ in range(n_layers):
            post_conv_height = (post_conv_height - 3 + 2) // 2 + 1
        gru_in = filters[-1] * post_conv_height
        h = embedding_dim
        sc = 1.0 / math.sqrt(h)
        self.w_ih = normal((3 * h, gru_in), sc)
        self.w_hh = normal((3 * h, h), sc)
        self.b_ih = normal((3 * h,), sc)
        self.b_hh = normal((3 * h,), sc)

        # encoder_bottleneck: Linear(embedding_dim -> 2*prosody_embedding_dim)
        self.wb = normal((2 * prosody_embedding_dim, embedding_dim),
                         1.0 / math.sqrt(embedding_dim))
        self.bb = normal((2 * prosody_embedding_dim,), 0.1)

        # attention projections (no bias)
        self.wq = normal((fg_attention_dim, encoder_embedding_dim),
                         1.0 / math.sqrt(encoder_embedding_dim))
        self.wk = normal((fg_attention_dim, prosody_embedding_dim),
                         1.0 / math.sqrt(prosody_embedding_dim))

    def _add_coords(self, x_nhwc):
        n, h, w, _ = x_nhwc.shape
        xx = (jnp.arange(h, dtype=jnp.float32) / (h - 1)) * 2.0 - 1.0   # varies along H
        yy = (jnp.arange(w, dtype=jnp.float32) / (w - 1)) * 2.0 - 1.0   # varies along W
        xx_ch = jnp.broadcast_to(xx[None, :, None, None], (n, h, w, 1))
        yy_ch = jnp.broadcast_to(yy[None, None, :, None], (n, h, w, 1))
        rr_ch = jnp.sqrt((xx_ch - 0.5) ** 2 + (yy_ch - 0.5) ** 2)
        return jnp.concatenate([x_nhwc, xx_ch, yy_ch, rr_ch], axis=-1)

    def forward(self, embedded_text, text_lengths, mels, mels_lengths):
        n = mels.shape[0]
        x = mels.reshape(n, -1, self.num_mel)[..., None]   # NHWC, C=1
        x = self._add_coords(x)                            # C=4 (CoordConv2d, with_r=True)

        for (w, b, gamma, beta, rmean, rvar) in self.conv_params:
            patches, (nn_, hh, wout) = im2col_stride_w2(x)
            kdim = patches.shape[1]
            w_mat = jnp.transpose(w, (2, 3, 1, 0)).reshape(kdim, -1)
            scale = gamma / jnp.sqrt(rvar + self.eps)       # folded BatchNorm (eval)
            shift = beta + scale * (b - rmean)
            y = matmul_scale_shift(patches, w_mat, scale, shift, relu=True)
            x = y.reshape(nn_, hh, wout, -1)

        # [N, T, pch, C] -> [N, T, C, pch] -> [N, T, C*pch] (matches PyTorch flattening)
        nn_, tt, pch, cc = x.shape
        gru_in = jnp.transpose(x, (0, 1, 3, 2)).reshape(nn_, tt, cc * pch)
        memory = gru_forward(gru_in, self.w_ih, self.w_hh, self.b_ih, self.b_hh)

        # masks: assumes max(lengths) equals the corresponding full sequence length,
        # which is required for the original bmm shapes to match anyway.
        # TODO(synk): get_mask_from_lengths uses a data-dependent max_len; static here.
        s = embedded_text.shape[1]
        t = memory.shape[1]
        text_mask = (jnp.arange(s)[None, :] < text_lengths[:, None]
                     ).astype(jnp.float32)[:, :, None]      # [N, S, 1]
        mels_mask = (jnp.arange(t)[None, :] < mels_lengths[:, None]
                     ).astype(jnp.float32)[:, None, :]      # [N, 1, T]

        style, align = bottleneck_attention(
            memory, embedded_text, text_mask, mels_mask,
            self.wb, self.bb, self.wq, self.wk,
            split=self.prosody_embedding_dim, d_k=self.d_k)
        return style, align


# ----------------------------------------------------------------------------
if __name__ == "__main__":
    num_mel = 64
    embedding_dim = 32
    prosody_embedding_dim = 32
    encoder_embedding_dim = 64
    fg_attention_dim = 32
    fg_attention_dropout = 0.1   # Dropout is identity in eval mode
    N, T, S = 2, 16, 8

    key = jax.random.PRNGKey(0)
    k_param, k_text, k_mel = jax.random.split(key, 3)

    model = FineGrainedReferenceEncoderPallas(
        k_param, num_mel, embedding_dim, prosody_embedding_dim,
        encoder_embedding_dim, fg_attention_dim)

    embedded_text = jax.random.normal(k_text, (N, S, encoder_embedding_dim), jnp.float32)
    mels = jax.random.normal(k_mel, (N, T, num_mel), jnp.float32)
    text_lengths = jnp.array([S, 5], dtype=jnp.int32)
    mels_lengths = jnp.array([T, 10], dtype=jnp.int32)

    style_embed, alignments = model.forward(embedded_text, text_lengths, mels, mels_lengths)
    style_embed, alignments = jax.block_until_ready((style_embed, alignments))

    assert style_embed.shape == (N, S, prosody_embedding_dim), style_embed.shape
    assert alignments.shape == (N, S, T), alignments.shape
    assert bool(jnp.all(jnp.isfinite(style_embed)))
    assert bool(jnp.all(jnp.isfinite(alignments)))
    print("KERNEL_OK")
</pallas_src>

<mosaic_0001>
module attributes {stable_mosaic.version = 11 : i64} {
  func.func @_matmul_scale_shift_kernel(%arg0: i32, %arg1: memref<512x36xf32, #tpu.memory_space<vmem>>, %arg2: memref<36x32xf32, #tpu.memory_space<vmem>>, %arg3: memref<1x32xf32, #tpu.memory_space<vmem>>, %arg4: memref<1x32xf32, #tpu.memory_space<vmem>>, %arg5: memref<512x32xf32, #tpu.memory_space<vmem>>) attributes {dimension_semantics = [#tpu.dimension_semantics<parallel>], iteration_bounds = array<i64: 2>, scalar_prefetch = 0 : i64, scratch_operands = 0 : i64, tpu.core_type = #tpu.core_type<tc>, window_params = [{transform_indices = @transform_0, window_bounds = array<i64: 512, 36>}, {pipeline_mode = #tpu.pipeline_mode<synchronous>, transform_indices = @transform_1, window_bounds = array<i64: 36, 32>}, {pipeline_mode = #tpu.pipeline_mode<synchronous>, transform_indices = @transform_2, window_bounds = array<i64: 1, 32>}, {pipeline_mode = #tpu.pipeline_mode<synchronous>, transform_indices = @transform_3, window_bounds = array<i64: 1, 32>}, {transform_indices = @transform_4, window_bounds = array<i64: 512, 32>}]} {
    %c0 = arith.constant 0 : index
    %c0_0 = arith.constant 0 : index
    %0 = vector.load %arg1[%c0, %c0_0] : memref<512x36xf32, #tpu.memory_space<vmem>>, vector<512x36xf32>
    %c0_1 = arith.constant 0 : index
    %c0_2 = arith.constant 0 : index
    %1 = vector.load %arg2[%c0_1, %c0_2] : memref<36x32xf32, #tpu.memory_space<vmem>>, vector<36x32xf32>
    %cst = arith.constant dense<0.000000e+00> : vector<512x32xf32>
    %2 = tpu.matmul %0, %1, %cst {dimension_numbers = #tpu.dot_dimension_numbers<[1], [0], [0], [1], [0, 0, 1, 1], [], []>} : vector<512x36xf32>, vector<36x32xf32>, vector<512x32xf32> -> vector<512x32xf32>
    %c0_3 = arith.constant 0 : index
    %c0_4 = arith.constant 0 : index
    %3 = vector.load %arg3[%c0_3, %c0_4] : memref<1x32xf32, #tpu.memory_space<vmem>>, vector<1x32xf32>
    %4 = vector.broadcast %3 : vector<1x32xf32> to vector<512x32xf32>
    %5 = arith.mulf %2, %4 : vector<512x32xf32>
    %c0_5 = arith.constant 0 : index
    %c0_6 = arith.constant 0 : index
    %6 = vector.load %arg4[%c0_5, %c0_6] : memref<1x32xf32, #tpu.memory_space<vmem>>, vector<1x32xf32>
    %7 = vector.broadcast %6 : vector<1x32xf32> to vector<512x32xf32>
    %8 = arith.addf %5, %7 : vector<512x32xf32>
    %cst_7 = arith.constant 0.000000e+00 : f32
    %9 = vector.broadcast %cst_7 : f32 to vector<512x32xf32>
    %10 = arith.maximumf %8, %9 : vector<512x32xf32>
    %c0_8 = arith.constant 0 : index
    %c0_9 = arith.constant 0 : index
    %11 = vector.load %arg5[%c0_8, %c0_9] : memref<512x32xf32, #tpu.memory_space<vmem>>, vector<512x32xf32>
    tpu.vector_store %arg5[%c0_8, %c0_9], %10 {strides = array<i32>} : memref<512x32xf32, #tpu.memory_space<vmem>>, vector<512x32xf32>,
    return
  }
  func.func @transform_0(%arg0: i32) -> (i32, i32) {
    %c0_i32 = arith.constant 0 : i32
    %c0_i32_0 = arith.constant 0 : i32
    return %arg0, %c0_i32 : i32, i32
  }
  func.func @transform_1(%arg0: i32) -> (i32, i32) {
    %c0_i32 = arith.constant 0 : i32
    %c0_i32_0 = arith.constant 0 : i32
    %c0_i32_1 = arith.constant 0 : i32
    return %c0_i32, %c0_i32_0 : i32, i32
  }
  func.func @transform_2(%arg0: i32) -> (i32, i32) {
    %c0_i32 = arith.constant 0 : i32
    %c0_i32_0 = arith.constant 0 : i32
    %c0_i32_1 = arith.constant 0 : i32
    return %c0_i32, %c0_i32_0 : i32, i32
  }
  func.func @transform_3(%arg0: i32) -> (i32, i32) {
    %c0_i32 = arith.constant 0 : i32
    %c0_i32_0 = arith.constant 0 : i32
    %c0_i32_1 = arith.constant 0 : i32
    return %c0_i32, %c0_i32_0 : i32, i32
  }
  func.func @transform_4(%arg0: i32) -> (i32, i32) {
    %c0_i32 = arith.constant 0 : i32
    %c0_i32_0 = arith.constant 0 : i32
    return %arg0, %c0_i32 : i32, i32
  }
}

</mosaic_0001>

<bundles_post_ra>
// kernel: tpu_custom_call.1
= control target key start
LH: loop header
LB: loop body
LE: loop exit
PB: predicated region body
PF: predicated region fallthrough
CT: control target
= control target key end

     0   :  { %s1131_s15 = smov 0   ;;  %s1568_s0 = inlined_call_operand.vmem [shape: f32[1024,36], index: 0, kind: input, shape index: {}]   ;;  %s1569_s1 = inlined_call_operand.vmem [shape: f32[36,32], index: 1, kind: input, shape index: {}]   ;;  %s1570_s2 = inlined_call_operand.vmem [shape: f32[1,32], index: 2, kind: input, shape index: {}]   ;;  %s1571_s3 = inlined_call_operand.vmem [shape: f32[1,32], index: 3, kind: input, shape index: {}]   ;;  %s1572_s4 = inlined_call_operand.vmem [shape: f32[1024,32], index: 4, kind: output, shape index: {}]  }
   0x1 LB: > { %s997_s16 = sadd.s32 4294967295, %s1104_s15   ;;  %p1001_p0 = scmp.ge.s32.totalorder %s1104_s15, 1  ;;  %s1104_s15 = sphi %s1131_s15, %s14_s15  }
   0x2   : > { %p163_p1 = scmp.lt.s32.totalorder %s1104_s15, 3 }
   0x4   : > { %p164_p2 = pnand %p1001_p0, %p163_p1 }
   0x5   : > { %s1002_s21 = sshll.u32 (!%p164_p2), %s997_s16, 6 }
   0x6   : > { %167 = sbr.rel (%p164_p2) target bundleno = 281 (0x119), region = 36  ;;  %p190_p3 = scmp.lt.s32.totalorder (!%p164_p2), %s1002_s21, 127 }
   0xb   : > { %v269_v0 = vld [vmem:[%s1569_s1 + $0x20] sm:$0xf]  ;;  %vm463_vm0 = vcmask 1043456   ;;  %v268_v1 = vld [vmem:[%s1569_s1 + $0x18] sm:$0xff]  ;;  %v267_v2 = vld [vmem:[%s1569_s1 + $0x10] sm:$0xff]  ;;  %s1574_s21 = smov (!%p190_p3, %s1002_s21), 127 }
   0xc   : > { %1074 = vmatpush.msk.msra.mxu2 %vm463_vm0, %v269_v0  ;;  %1075 = vmatpush.msk.msra.mxu3 %vm463_vm0, %v269_v0  ;;  %v266_v3 = vld [vmem:[%s1569_s1 + $0x8] sm:$0xff]  ;;  %s1003_s26 = sshll.u32 %s1574_s21, 3  ;;  %v265_v4 = vld [vmem:[%s1569_s1] sm:$0xff]  ;;  %vm270_vm1 = vcmask 293888   ;;  %vm876_vm2 = vcmask 261120  }
   0xd   : > { %1006 = vmatpush.msk.msra.mxu0 %vm463_vm0, %v269_v0  ;;  %1073 = vmatpush.msk.msra.mxu1 %vm463_vm0, %v269_v0  ;;  %s1162_s5 = scalar_lea.vmem %s1568_s0, %s1003_s26  ;;  %s1311_s12 = scalar_lea.vmem %s1572_s4, %s1003_s26 }
   0xe   : > { %1077 = vmatpush.msra.mxu2 %v268_v1  ;;  %1078 = vmatpush.msra.mxu3 %v268_v1  ;;  %v233_v5 = vld [vmem:[%s1162_s5 + $0x100] sm:$0xff]  ;;  %v234_v9 = vld [vmem:[%s1162_s5 + $0x108] sm:$0xff]  ;;  %v235_v13 = vld [vmem:[%s1162_s5 + $0x110] sm:$0xff] }
   0xf   : > { %479 = vmatpush.msra.mxu0 %v268_v1  ;;  %1076 = vmatpush.msra.mxu1 %v268_v1  ;;  %v249_v6 = vld [vmem:[%s1162_s5 + $0x180] sm:$0xff]  ;;  %v250_v10 = vld [vmem:[%s1162_s5 + $0x188] sm:$0xff]  ;;  %v251_v14 = vld [vmem:[%s1162_s5 + $0x190] sm:$0xff] }
  0x10   : > { %1080 = vmatpush.msra.mxu2 %v267_v2  ;;  %1081 = vmatpush.msra.mxu3 %v267_v2  ;;  %v201_v7 = vld [vmem:[%s1162_s5] sm:$0xff]  ;;  %v202_v11 = vld [vmem:[%s1162_s5 + $0x8] sm:$0xff]  ;;  %v203_v15 = vld [vmem:[%s1162_s5 + $0x10] sm:$0xff] }
  0x11   : > { %480 = vmatpush.msra.mxu0 %v267_v2  ;;  %1079 = vmatpush.msra.mxu1 %v267_v2  ;;  %v217_v8 = vld [vmem:[%s1162_s5 + $0x80] sm:$0xff]  ;;  %v218_v12 = vld [vmem:[%s1162_s5 + $0x88] sm:$0xff]  ;;  %v219_v16 = vld [vmem:[%s1162_s5 + $0x90] sm:$0xff] }
  0x12   : > { %1083 = vmatpush.msra.mxu2 %v266_v3  ;;  %1084 = vmatpush.msra.mxu3 %v266_v3  ;;  %v236_v17 = vld [vmem:[%s1162_s5 + $0x118] sm:$0xff]  ;;  %v237_v21 = vld [vmem:[%s1162_s5 + $0x120] sm:$0xff]  ;;  %v238_v25 = vld [vmem:[%s1162_s5 + $0x128] sm:$0xff] }
  0x13   : > { %481 = vmatpush.msra.mxu0 %v266_v3  ;;  %1082 = vmatpush.msra.mxu1 %v266_v3  ;;  %v252_v18 = vld [vmem:[%s1162_s5 + $0x198] sm:$0xff]  ;;  %v253_v22 = vld [vmem:[%s1162_s5 + $0x1a0] sm:$0xff]  ;;  %v254_v26 = vld [vmem:[%s1162_s5 + $0x1a8] sm:$0xff] }
  0x14   : > { %1086 = vmatpush.msra.mxu2 %v265_v4  ;;  %1087 = vmatpush.msra.mxu3 %v265_v4  ;;  %v204_v19 = vld [vmem:[%s1162_s5 + $0x18] sm:$0xff]  ;;  %v205_v23 = vld [vmem:[%s1162_s5 + $0x20] sm:$0xff]  ;;  %v206_v27 = vld [vmem:[%s1162_s5 + $0x28] sm:$0xff] }
  0x15   : > { %1039 = vmatmul.msk.f32.vlgmr.msra.gmra.mxu2 %vm270_vm1, %v233_v5  ;;  %1055 = vmatmul.msk.f32.vlgmr.msra.gmra.mxu3 %vm270_vm1, %v249_v6  ;;  %v220_v20 = vld [vmem:[%s1162_s5 + $0x98] sm:$0xff]  ;;  %v221_v24 = vld [vmem:[%s1162_s5 + $0xa0] sm:$0xff]  ;;  %v222_v28 = vld [vmem:[%s1162_s5 + $0xa8] sm:$0xff] }
  0x16   : > { %482 = vmatpush.msra.mxu0 %v265_v4  ;;  %1085 = vmatpush.msra.mxu1 %v265_v4  ;;  %v239_v29 = vld [vmem:[%s1162_s5 + $0x130] sm:$0xff]  ;;  %v240_v33 = vld [vmem:[%s1162_s5 + $0x138] sm:$0xff]  ;;  %v241_v37 = vld [vmem:[%s1162_s5 + $0x140] sm:$0xff] }
  0x17   : > { %1007 = vmatmul.msk.f32.vlgmr.msra.gmra.mxu0 %vm270_vm1, %v201_v7  ;;  %1023 = vmatmul.msk.f32.vlgmr.msra.gmra.mxu1 %vm270_vm1, %v217_v8  ;;  %v255_v30 = vld [vmem:[%s1162_s5 + $0x1b0] sm:$0xff]  ;;  %v256_v34 = vld [vmem:[%s1162_s5 + $0x1b8] sm:$0xff]  ;;  %v257_v38 = vld [vmem:[%s1162_s5 + $0x1c0] sm:$0xff] }
  0x18   : > { %v207_v31 = vld [vmem:[%s1162_s5 + $0x30] sm:$0xff]  ;;  %v208_v35 = vld [vmem:[%s1162_s5 + $0x38] sm:$0xff]  ;;  %v209_v39 = vld [vmem:[%s1162_s5 + $0x40] sm:$0xff] }
  0x19   : > { %v223_v32 = vld [vmem:[%s1162_s5 + $0xb0] sm:$0xff]  ;;  %v224_v36 = vld [vmem:[%s1162_s5 + $0xb8] sm:$0xff]  ;;  %v225_v40 = vld [vmem:[%s1162_s5 + $0xc0] sm:$0xff] }
  0x1a   : > { %v242_v41 = vld [vmem:[%s1162_s5 + $0x148] sm:$0xff]  ;;  %v243_v45 = vld [vmem:[%s1162_s5 + $0x150] sm:$0xff]  ;;  %v244_v49 = vld [vmem:[%s1162_s5 + $0x158] sm:$0xff] }
  0x1b   : > { %v258_v42 = vld [vmem:[%s1162_s5 + $0x1c8] sm:$0xff]  ;;  %v259_v46 = vld [vmem:[%s1162_s5 + $0x1d0] sm:$0xff]  ;;  %v260_v50 = vld [vmem:[%s1162_s5 + $0x1d8] sm:$0xff] }
  0x1c   : > { %v210_v43 = vld [vmem:[%s1162_s5 + $0x48] sm:$0xff]  ;;  %v211_v47 = vld [vmem:[%s1162_s5 + $0x50] sm:$0xff]  ;;  %v212_v51 = vld [vmem:[%s1162_s5 + $0x58] sm:$0xff] }
  0x1d   : > { %1040 = vmatmul.msk.f32.gmra.mxu2 %vm270_vm1, %v234_v9  ;;  %1056 = vmatmul.msk.f32.gmra.mxu3 %vm270_vm1, %v250_v10  ;;  %v226_v44 = vld [vmem:[%s1162_s5 + $0xc8] sm:$0xff]  ;;  %v227_v48 = vld [vmem:[%s1162_s5 + $0xd0] sm:$0xff]  ;;  %v228_v52 = vld [vmem:[%s1162_s5 + $0xd8] sm:$0xff] }
  0x1e   : > { %v245_v53 = vld [vmem:[%s1162_s5 + $0x160] sm:$0xff]  ;;  %v246_v57 = vld [vmem:[%s1162_s5 + $0x168] sm:$0xff]  ;;  %v247_v61 = vld [vmem:[%s1162_s5 + $0x170] sm:$0xff] }
  0x1f   : > { %1008 = vmatmul.msk.f32.gmra.mxu0 %vm270_vm1, %v202_v11  ;;  %1024 = vmatmul.msk.f32.gmra.mxu1 %vm270_vm1, %v218_v12  ;;  %v261_v54 = vld [vmem:[%s1162_s5 + $0x1e0] sm:$0xff]  ;;  %v262_v58 = vld [vmem:[%s1162_s5 + $0x1e8] sm:$0xff]  ;;  %v263_v62 = vld [vmem:[%s1162_s5 + $0x1f0] sm:$0xff] }
  0x20   : > { %v213_v55 = vld [vmem:[%s1162_s5 + $0x60] sm:$0xff]  ;;  %v214_v59 = vld [vmem:[%s1162_s5 + $0x68] sm:$0xff]  ;;  %v215_v63 = vld [vmem:[%s1162_s5 + $0x70] sm:$0xff] }
  0x21   : > { %v229_v56 = vld [vmem:[%s1162_s5 + $0xe0] sm:$0xff]  ;;  %v230_v60 = vld [vmem:[%s1162_s5 + $0xe8] sm:$0xff]  ;;  %v231_v0 = vld [vmem:[%s1162_s5 + $0xf0] sm:$0xff] }
  0x22   : > { %v248_v1 = vld [vmem:[%s1162_s5 + $0x178] sm:$0xff]  ;;  %v1295_v5 = vld [vmem:[%s1570_s2] ss:$0 sm:$0xff] }
  0x23   : > { %v264_v2 = vld [vmem:[%s1162_s5 + $0x1f8] sm:$0xff]  ;;  %v1300_v6 = vld [vmem:[%s1571_s3] ss:$0 sm:$0xff] }
  0x24   : > { %v216_v3 = vld [vmem:[%s1162_s5 + $0x78] sm:$0xff] }
  0x25   : > { %1041 = vmatmul.msk.f32.gmra.mxu2 %vm270_vm1, %v235_v13  ;;  %1057 = vmatmul.msk.f32.gmra.mxu3 %vm270_vm1, %v251_v14  ;;  %v232_v4 = vld [vmem:[%s1162_s5 + $0xf8] sm:$0xff] }
  0x27   : > { %1009 = vmatmul.msk.f32.gmra.mxu0 %vm270_vm1, %v203_v15  ;;  %1025 = vmatmul.msk.f32.gmra.mxu1 %vm270_vm1, %v219_v16 }
  0x2d   : > { %1042 = vmatmul.msk.f32.gmra.mxu2 %vm270_vm1, %v236_v17  ;;  %1058 = vmatmul.msk.f32.gmra.mxu3 %vm270_vm1, %v252_v18 }
  0x2f   : > { %1010 = vmatmul.msk.f32.gmra.mxu0 %vm270_vm1, %v204_v19  ;;  %1026 = vmatmul.msk.f32.gmra.mxu1 %vm270_vm1, %v220_v20 }
  0x35   : > { %1043 = vmatmul.msk.f32.gmra.mxu2 %vm270_vm1, %v237_v21  ;;  %1059 = vmatmul.msk.f32.gmra.mxu3 %vm270_vm1, %v253_v22 }
  0x37   : > { %1011 = vmatmul.msk.f32.gmra.mxu0 %vm270_vm1, %v205_v23  ;;  %1027 = vmatmul.msk.f32.gmra.mxu1 %vm270_vm1, %v221_v24 }
  0x3d   : > { %1044 = vmatmul.msk.f32.gmra.mxu2 %vm270_vm1, %v238_v25  ;;  %1060 = vmatmul.msk.f32.gmra.mxu3 %vm270_vm1, %v254_v26 }
  0x3f   : > { %1012 = vmatmul.msk.f32.gmra.mxu0 %vm270_vm1, %v206_v27  ;;  %1028 = vmatmul.msk.f32.gmra.mxu1 %vm270_vm1, %v222_v28 }
  0x45   : > { %1045 = vmatmul.msk.f32.gmra.mxu2 %vm270_vm1, %v239_v29  ;;  %1061 = vmatmul.msk.f32.gmra.mxu3 %vm270_vm1, %v255_v30 }
  0x47   : > { %1013 = vmatmul.msk.f32.gmra.mxu0 %vm270_vm1, %v207_v31  ;;  %1029 = vmatmul.msk.f32.gmra.mxu1 %vm270_vm1, %v223_v32 }
  0x4d   : > { %1046 = vmatmul.msk.f32.gmra.mxu2 %vm270_vm1, %v240_v33  ;;  %1062 = vmatmul.msk.f32.gmra.mxu3 %vm270_vm1, %v256_v34 }
  0x4f   : > { %1014 = vmatmul.msk.f32.gmra.mxu0 %vm270_vm1, %v208_v35  ;;  %1030 = vmatmul.msk.f32.gmra.mxu1 %vm270_vm1, %v224_v36 }
  0x55   : > { %1047 = vmatmul.msk.f32.gmra.mxu2 %vm270_vm1, %v241_v37  ;;  %1063 = vmatmul.msk.f32.gmra.mxu3 %vm270_vm1, %v257_v38 }
  0x57   : > { %1015 = vmatmul.msk.f32.gmra.mxu0 %vm270_vm1, %v209_v39  ;;  %1031 = vmatmul.msk.f32.gmra.mxu1 %vm270_vm1, %v225_v40 }
  0x5d   : > { %1048 = vmatmul.msk.f32.gmra.mxu2 %vm270_vm1, %v242_v41  ;;  %1064 = vmatmul.msk.f32.gmra.mxu3 %vm270_vm1, %v258_v42 }
  0x5f   : > { %1016 = vmatmul.msk.f32.gmra.mxu0 %vm270_vm1, %v210_v43  ;;  %1032 = vmatmul.msk.f32.gmra.mxu1 %vm270_vm1, %v226_v44 }
  0x65   : > { %1049 = vmatmul.msk.f32.gmra.mxu2 %vm270_vm1, %v243_v45  ;;  %1065 = vmatmul.msk.f32.gmra.mxu3 %vm270_vm1, %v259_v46 }
  0x67   : > { %1017 = vmatmul.msk.f32.gmra.mxu0 %vm270_vm1, %v211_v47  ;;  %1033 = vmatmul.msk.f32.gmra.mxu1 %vm270_vm1, %v227_v48 }
  0x6d   : > { %1050 = vmatmul.msk.f32.gmra.mxu2 %vm270_vm1, %v244_v49  ;;  %1066 = vmatmul.msk.f32.gmra.mxu3 %vm270_vm1, %v260_v50 }
  0x6f   : > { %1018 = vmatmul.msk.f32.gmra.mxu0 %vm270_vm1, %v212_v51  ;;  %1034 = vmatmul.msk.f32.gmra.mxu1 %vm270_vm1, %v228_v52 }
  0x75   : > { %1051 = vmatmul.msk.f32.gmra.mxu2 %vm270_vm1, %v245_v53  ;;  %1067 = vmatmul.msk.f32.gmra.mxu3 %vm270_vm1, %v261_v54 }
  0x77   : > { %1019 = vmatmul.msk.f32.gmra.mxu0 %vm270_vm1, %v213_v55  ;;  %1035 = vmatmul.msk.f32.gmra.mxu1 %vm270_vm1, %v229_v56 }
  0x7d   : > { %1052 = vmatmul.msk.f32.gmra.mxu2 %vm270_vm1, %v246_v57  ;;  %1068 = vmatmul.msk.f32.gmra.mxu3 %vm270_vm1, %v262_v58 }
  0x7f   : > { %1020 = vmatmul.msk.f32.gmra.mxu0 %vm270_vm1, %v214_v59  ;;  %1036 = vmatmul.msk.f32.gmra.mxu1 %vm270_vm1, %v230_v60 }
  0x85   : > { %1053 = vmatmul.msk.f32.gmra.mxu2 %vm270_vm1, %v247_v61  ;;  %1069 = vmatmul.msk.f32.gmra.mxu3 %vm270_vm1, %v263_v62 }
  0x87   : > { %1021 = vmatmul.msk.f32.gmra.mxu0 %vm270_vm1, %v215_v63  ;;  %1037 = vmatmul.msk.f32.gmra.mxu1 %vm270_vm1, %v231_v0 }
  0x8d   : > { %1054 = vmatmul.msk.f32.gmra.mxu2 %vm270_vm1, %v248_v1  ;;  %1070 = vmatmul.msk.f32.gmra.mxu3 %vm270_vm1, %v264_v2 }
  0x8f   : > { %1022 = vmatmul.msk.f32.gmra.mxu0 %vm270_vm1, %v216_v3  ;;  %1038 = vmatmul.msk.f32.gmra.mxu1 %vm270_vm1, %v232_v4 }
  0x94   : > { %v484_v7 = vpop.f32.mrf.mxu0  ;;  %v532_v8 = vpop.f32.mrf.mxu1 }
  0x95   : > { %v680_v9 = vmul.f32 %v1295_v5, %v484_v7  ;;  %v696_v10 = vmul.f32 %v1295_v5, %v532_v8 }
  0x97   : > { %v748_v11 = vadd.f32 %v1300_v6, %v680_v9  ;;  %v764_v12 = vadd.f32 %v1300_v6, %v696_v10 }
  0x98   : > { %v580_v13 = vpop.f32.mrf.mxu2  ;;  %v628_v14 = vpop.f32.mrf.mxu3 }
  0x99   : > { %v812_v15 = vmax.f32 %v748_v11, 0.0  ;;  %v828_v16 = vmax.f32 %v764_v12, 0.0  ;;  %v712_v17 = vmul.f32 %v1295_v5, %v580_v13  ;;  %v728_v18 = vmul.f32 %v1295_v5, %v628_v14 }
  0x9b   : > { %877 = vst.msk [vmem:[%s1311_s12] sm:$0xff] %vm876_vm2, %v812_v15  ;;  %v780_v19 = vadd.f32 %v1300_v6, %v712_v17  ;;  %v796_v20 = vadd.f32 %v1300_v6, %v728_v18 }
  0x9c   : > { %893 = vst.msk [vmem:[%s1311_s12 + $0x80] sm:$0xff] %vm876_vm2, %v828_v16  ;;  %v487_v21 = vpop.f32.mrf.mxu0  ;;  %v535_v22 = vpop.f32.mrf.mxu1 }
  0x9d   : > { %v844_v23 = vmax.f32 %v780_v19, 0.0  ;;  %v860_v24 = vmax.f32 %v796_v20, 0.0  ;;  %v681_v25 = vmul.f32 %v1295_v5, %v487_v21  ;;  %v697_v26 = vmul.f32 %v1295_v5, %v535_v22 }
  0x9f   : > { %909 = vst.msk [vmem:[%s1311_s12 + $0x100] sm:$0xff] %vm876_vm2, %v844_v23  ;;  %v749_v27 = vadd.f32 %v1300_v6, %v681_v25  ;;  %v765_v28 = vadd.f32 %v1300_v6, %v697_v26 }
  0xa0   : > { %925 = vst.msk [vmem:[%s1311_s12 + $0x180] sm:$0xff] %vm876_vm2, %v860_v24  ;;  %v583_v29 = vpop.f32.mrf.mxu2  ;;  %v631_v30 = vpop.f32.mrf.mxu3 }
  0xa1   : > { %v813_v31 = vmax.f32 %v749_v27, 0.0  ;;  %v829_v32 = vmax.f32 %v765_v28, 0.0  ;;  %v713_v33 = vmul.f32 %v1295_v5, %v583_v29  ;;  %v729_v34 = vmul.f32 %v1295_v5, %v631_v30 }
  0xa3   : > { %878 = vst.msk [vmem:[%s1311_s12 + $0x8] sm:$0xff] %vm876_vm2, %v813_v31  ;;  %v781_v35 = vadd.f32 %v1300_v6, %v713_v33  ;;  %v797_v36 = vadd.f32 %v1300_v6, %v729_v34 }
  0xa4   : > { %894 = vst.msk [vmem:[%s1311_s12 + $0x88] sm:$0xff] %vm876_vm2, %v829_v32  ;;  %v490_v37 = vpop.f32.mrf.mxu0  ;;  %v538_v38 = vpop.f32.mrf.mxu1 }
  0xa5   : > { %v845_v39 = vmax.f32 %v781_v35, 0.0  ;;  %v861_v40 = vmax.f32 %v797_v36, 0.0  ;;  %v682_v41 = vmul.f32 %v1295_v5, %v490_v37  ;;  %v698_v42 = vmul.f32 %v1295_v5, %v538_v38 }
  0xa7   : > { %910 = vst.msk [vmem:[%s1311_s12 + $0x108] sm:$0xff] %vm876_vm2, %v845_v39  ;;  %v750_v43 = vadd.f32 %v1300_v6, %v682_v41  ;;  %v766_v44 = vadd.f32 %v1300_v6, %v698_v42 }
  0xa8   : > { %926 = vst.msk [vmem:[%s1311_s12 + $0x188] sm:$0xff] %vm876_vm2, %v861_v40  ;;  %v586_v45 = vpop.f32.mrf.mxu2  ;;  %v634_v46 = vpop.f32.mrf.mxu3 }
  0xa9   : > { %v814_v47 = vmax.f32 %v750_v43, 0.0  ;;  %v830_v48 = vmax.f32 %v766_v44, 0.0  ;;  %v714_v49 = vmul.f32 %v1295_v5, %v586_v45  ;;  %v730_v50 = vmul.f32 %v1295_v5, %v634_v46 }
  0xab   : > { %879 = vst.msk [vmem:[%s1311_s12 + $0x10] sm:$0xff] %vm876_vm2, %v814_v47  ;;  %v782_v51 = vadd.f32 %v1300_v6, %v714_v49  ;;  %v798_v52 = vadd.f32 %v1300_v6, %v730_v50 }
  0xac   : > { %895 = vst.msk [vmem:[%s1311_s12 + $0x90] sm:$0xff] %vm876_vm2, %v830_v48  ;;  %v493_v53 = vpop.f32.mrf.mxu0  ;;  %v541_v54 = vpop.f32.mrf.mxu1 }
  0xad   : > { %v846_v55 = vmax.f32 %v782_v51, 0.0  ;;  %v862_v56 = vmax.f32 %v798_v52, 0.0  ;;  %v683_v57 = vmul.f32 %v1295_v5, %v493_v53  ;;  %v699_v58 = vmul.f32 %v1295_v5, %v541_v54 }
  0xaf   : > { %911 = vst.msk [vmem:[%s1311_s12 + $0x110] sm:$0xff] %vm876_vm2, %v846_v55  ;;  %v751_v59 = vadd.f32 %v1300_v6, %v683_v57  ;;  %v767_v60 = vadd.f32 %v1300_v6, %v699_v58 }
  0xb0   : > { %927 = vst.msk [vmem:[%s1311_s12 + $0x190] sm:$0xff] %vm876_vm2, %v862_v56  ;;  %v589_v61 = vpop.f32.mrf.mxu2  ;;  %v637_v62 = vpop.f32.mrf.mxu3 }
  0xb1   : > { %v815_v63 = vmax.f32 %v751_v59, 0.0  ;;  %v831_v0 = vmax.f32 %v767_v60, 0.0  ;;  %v715_v1 = vmul.f32 %v1295_v5, %v589_v61  ;;  %v731_v2 = vmul.f32 %v1295_v5, %v637_v62 }
  0xb3   : > { %880 = vst.msk [vmem:[%s1311_s12 + $0x18] sm:$0xff] %vm876_vm2, %v815_v63  ;;  %v783_v3 = vadd.f32 %v1300_v6, %v715_v1  ;;  %v799_v4 = vadd.f32 %v1300_v6, %v731_v2 }
  0xb4   : > { %896 = vst.msk [vmem:[%s1311_s12 + $0x98] sm:$0xff] %vm876_vm2, %v831_v0  ;;  %v496_v7 = vpop.f32.mrf.mxu0  ;;  %v544_v8 = vpop.f32.mrf.mxu1 }
  0xb5   : > { %v847_v9 = vmax.f32 %v783_v3, 0.0  ;;  %v863_v10 = vmax.f32 %v799_v4, 0.0  ;;  %v684_v11 = vmul.f32 %v1295_v5, %v496_v7  ;;  %v700_v12 = vmul.f32 %v1295_v5, %v544_v8 }
  0xb7   : > { %912 = vst.msk [vmem:[%s1311_s12 + $0x118] sm:$0xff] %vm876_vm2, %v847_v9  ;;  %v752_v13 = vadd.f32 %v1300_v6, %v684_v11  ;;  %v768_v14 = vadd.f32 %v1300_v6, %v700_v12 }
  0xb8   : > { %928 = vst.msk [vmem:[%s1311_s12 + $0x198] sm:$0xff] %vm876_vm2, %v863_v10  ;;  %v592_v15 = vpop.f32.mrf.mxu2  ;;  %v640_v16 = vpop.f32.mrf.mxu3 }
  0xb9   : > { %v816_v17 = vmax.f32 %v752_v13, 0.0  ;;  %v832_v18 = vmax.f32 %v768_v14, 0.0  ;;  %v716_v19 = vmul.f32 %v1295_v5, %v592_v15  ;;  %v732_v20 = vmul.f32 %v1295_v5, %v640_v16 }
  0xbb   : > { %881 = vst.msk [vmem:[%s1311_s12 + $0x20] sm:$0xff] %vm876_vm2, %v816_v17  ;;  %v784_v21 = vadd.f32 %v1300_v6, %v716_v19  ;;  %v800_v22 = vadd.f32 %v1300_v6, %v732_v20 }
  0xbc   : > { %897 = vst.msk [vmem:[%s1311_s12 + $0xa0] sm:$0xff] %vm876_vm2, %v832_v18  ;;  %v499_v23 = vpop.f32.mrf.mxu0  ;;  %v547_v24 = vpop.f32.mrf.mxu1 }
  0xbd   : > { %v848_v25 = vmax.f32 %v784_v21, 0.0  ;;  %v864_v26 = vmax.f32 %v800_v22, 0.0  ;;  %v685_v27 = vmul.f32 %v1295_v5, %v499_v23  ;;  %v701_v28 = vmul.f32 %v1295_v5, %v547_v24 }
  0xbf   : > { %913 = vst.msk [vmem:[%s1311_s12 + $0x120] sm:$0xff] %vm876_vm2, %v848_v25  ;;  %v753_v29 = vadd.f32 %v1300_v6, %v685_v27  ;;  %v769_v30 = vadd.f32 %v1300_v6, %v701_v28 }
  0xc0   : > { %929 = vst.msk [vmem:[%s1311_s12 + $0x1a0] sm:$0xff] %vm876_vm2, %v864_v26  ;;  %v595_v31 = vpop.f32.mrf.mxu2  ;;  %v643_v32 = vpop.f32.mrf.mxu3 }
  0xc1   : > { %v817_v33 = vmax.f32 %v753_v29, 0.0  ;;  %v833_v34 = vmax.f32 %v769_v30, 0.0  ;;  %v717_v35 = vmul.f32 %v1295_v5, %v595_v31  ;;  %v733_v36 = vmul.f32 %v1295_v5, %v643_v32 }
  0xc3   : > { %882 = vst.msk [vmem:[%s1311_s12 + $0x28] sm:$0xff] %vm876_vm2, %v817_v33  ;;  %v785_v37 = vadd.f32 %v1300_v6, %v717_v35  ;;  %v801_v38 = vadd.f32 %v1300_v6, %v733_v36 }
  0xc4   : > { %898 = vst.msk [vmem:[%s1311_s12 + $0xa8] sm:$0xff] %vm876_vm2, %v833_v34  ;;  %v502_v39 = vpop.f32.mrf.mxu0  ;;  %v550_v40 = vpop.f32.mrf.mxu1 }
  0xc5   : > { %v849_v41 = vmax.f32 %v785_v37, 0.0  ;;  %v865_v42 = vmax.f32 %v801_v38, 0.0  ;;  %v686_v43 = vmul.f32 %v1295_v5, %v502_v39  ;;  %v702_v44 = vmul.f32 %v1295_v5, %v550_v40 }
  0xc7   : > { %914 = vst.msk [vmem:[%s1311_s12 + $0x128] sm:$0xff] %vm876_vm2, %v849_v41  ;;  %v754_v45 = vadd.f32 %v1300_v6, %v686_v43  ;;  %v770_v46 = vadd.f32 %v1300_v6, %v702_v44 }
  0xc8   : > { %930 = vst.msk [vmem:[%s1311_s12 + $0x1a8] sm:$0xff] %vm876_vm2, %v865_v42  ;;  %v598_v47 = vpop.f32.mrf.mxu2  ;;  %v646_v48 = vpop.f32.mrf.mxu3 }
  0xc9   : > { %v818_v49 = vmax.f32 %v754_v45, 0.0  ;;  %v834_v50 = vmax.f32 %v770_v46, 0.0  ;;  %v718_v51 = vmul.f32 %v1295_v5, %v598_v47  ;;  %v734_v52 = vmul.f32 %v1295_v5, %v646_v48 }
  0xcb   : > { %883 = vst.msk [vmem:[%s1311_s12 + $0x30] sm:$0xff] %vm876_vm2, %v818_v49  ;;  %v786_v53 = vadd.f32 %v1300_v6, %v718_v51  ;;  %v802_v54 = vadd.f32 %v1300_v6, %v734_v52 }
  0xcc   : > { %899 = vst.msk [vmem:[%s1311_s12 + $0xb0] sm:$0xff] %vm876_vm2, %v834_v50  ;;  %v505_v55 = vpop.f32.mrf.mxu0  ;;  %v553_v56 = vpop.f32.mrf.mxu1 }
  0xcd   : > { %v850_v57 = vmax.f32 %v786_v53, 0.0  ;;  %v866_v58 = vmax.f32 %v802_v54, 0.0  ;;  %v687_v59 = vmul.f32 %v1295_v5, %v505_v55  ;;  %v703_v60 = vmul.f32 %v1295_v5, %v553_v56 }
  0xcf   : > { %915 = vst.msk [vmem:[%s1311_s12 + $0x130] sm:$0xff] %vm876_vm2, %v850_v57  ;;  %v755_v61 = vadd.f32 %v1300_v6, %v687_v59  ;;  %v771_v62 = vadd.f32 %v1300_v6, %v703_v60 }
  0xd0   : > { %931 = vst.msk [vmem:[%s1311_s12 + $0x1b0] sm:$0xff] %vm876_vm2, %v866_v58  ;;  %v601_v63 = vpop.f32.mrf.mxu2  ;;  %v649_v0 = vpop.f32.mrf.mxu3 }
  0xd1   : > { %v819_v1 = vmax.f32 %v755_v61, 0.0  ;;  %v835_v2 = vmax.f32 %v771_v62, 0.0  ;;  %v719_v3 = vmul.f32 %v1295_v5, %v601_v63  ;;  %v735_v4 = vmul.f32 %v1295_v5, %v649_v0 }
  0xd3   : > { %884 = vst.msk [vmem:[%s1311_s12 + $0x38] sm:$0xff] %vm876_vm2, %v819_v1  ;;  %v787_v7 = vadd.f32 %v1300_v6, %v719_v3  ;;  %v803_v8 = vadd.f32 %v1300_v6, %v735_v4 }
  0xd4   : > { %900 = vst.msk [vmem:[%s1311_s12 + $0xb8] sm:$0xff] %vm876_vm2, %v835_v2  ;;  %v508_v9 = vpop.f32.mrf.mxu0  ;;  %v556_v10 = vpop.f32.mrf.mxu1 }
  0xd5   : > { %v851_v11 = vmax.f32 %v787_v7, 0.0  ;;  %v867_v12 = vmax.f32 %v803_v8, 0.0  ;;  %v688_v13 = vmul.f32 %v1295_v5, %v508_v9  ;;  %v704_v14 = vmul.f32 %v1295_v5, %v556_v10 }
  0xd7   : > { %916 = vst.msk [vmem:[%s1311_s12 + $0x138] sm:$0xff] %vm876_vm2, %v851_v11  ;;  %v756_v15 = vadd.f32 %v1300_v6, %v688_v13  ;;  %v772_v16 = vadd.f32 %v1300_v6, %v704_v14 }
  0xd8   : > { %932 = vst.msk [vmem:[%s1311_s12 + $0x1b8] sm:$0xff] %vm876_vm2, %v867_v12  ;;  %v604_v17 = vpop.f32.mrf.mxu2  ;;  %v652_v18 = vpop.f32.mrf.mxu3 }
  0xd9   : > { %v820_v19 = vmax.f32 %v756_v15, 0.0  ;;  %v836_v20 = vmax.f32 %v772_v16, 0.0  ;;  %v720_v21 = vmul.f32 %v1295_v5, %v604_v17  ;;  %v736_v22 = vmul.f32 %v1295_v5, %v652_v18 }
  0xdb   : > { %885 = vst.msk [vmem:[%s1311_s12 + $0x40] sm:$0xff] %vm876_vm2, %v820_v19  ;;  %v788_v23 = vadd.f32 %v1300_v6, %v720_v21  ;;  %v804_v24 = vadd.f32 %v1300_v6, %v736_v22 }
  0xdc   : > { %901 = vst.msk [vmem:[%s1311_s12 + $0xc0] sm:$0xff] %vm876_vm2, %v836_v20  ;;  %v511_v25 = vpop.f32.mrf.mxu0  ;;  %v559_v26 = vpop.f32.mrf.mxu1 }
  0xdd   : > { %v852_v27 = vmax.f32 %v788_v23, 0.0  ;;  %v868_v28 = vmax.f32 %v804_v24, 0.0  ;;  %v689_v29 = vmul.f32 %v1295_v5, %v511_v25  ;;  %v705_v30 = vmul.f32 %v1295_v5, %v559_v26 }
  0xdf   : > { %917 = vst.msk [vmem:[%s1311_s12 + $0x140] sm:$0xff] %vm876_vm2, %v852_v27  ;;  %v757_v31 = vadd.f32 %v1300_v6, %v689_v29  ;;  %v773_v32 = vadd.f32 %v1300_v6, %v705_v30 }
  0xe0   : > { %933 = vst.msk [vmem:[%s1311_s12 + $0x1c0] sm:$0xff] %vm876_vm2, %v868_v28  ;;  %v607_v33 = vpop.f32.mrf.mxu2  ;;  %v655_v34 = vpop.f32.mrf.mxu3 }
  0xe1   : > { %v821_v35 = vmax.f32 %v757_v31, 0.0  ;;  %v837_v36 = vmax.f32 %v773_v32, 0.0  ;;  %v721_v37 = vmul.f32 %v1295_v5, %v607_v33  ;;  %v737_v38 = vmul.f32 %v1295_v5, %v655_v34 }
  0xe3   : > { %886 = vst.msk [vmem:[%s1311_s12 + $0x48] sm:$0xff] %vm876_vm2, %v821_v35  ;;  %v789_v39 = vadd.f32 %v1300_v6, %v721_v37  ;;  %v805_v40 = vadd.f32 %v1300_v6, %v737_v38 }
  0xe4   : > { %902 = vst.msk [vmem:[%s1311_s12 + $0xc8] sm:$0xff] %vm876_vm2, %v837_v36  ;;  %v514_v41 = vpop.f32.mrf.mxu0  ;;  %v562_v42 = vpop.f32.mrf.mxu1 }
  0xe5   : > { %v853_v43 = vmax.f32 %v789_v39, 0.0  ;;  %v869_v44 = vmax.f32 %v805_v40, 0.0  ;;  %v690_v45 = vmul.f32 %v1295_v5, %v514_v41  ;;  %v706_v46 = vmul.f32 %v1295_v5, %v562_v42 }
  0xe7   : > { %918 = vst.msk [vmem:[%s1311_s12 + $0x148] sm:$0xff] %vm876_vm2, %v853_v43  ;;  %v758_v47 = vadd.f32 %v1300_v6, %v690_v45  ;;  %v774_v48 = vadd.f32 %v1300_v6, %v706_v46 }
  0xe8   : > { %934 = vst.msk [vmem:[%s1311_s12 + $0x1c8] sm:$0xff] %vm876_vm2, %v869_v44  ;;  %v610_v49 = vpop.f32.mrf.mxu2  ;;  %v658_v50 = vpop.f32.mrf.mxu3 }
  0xe9   : > { %v822_v51 = vmax.f32 %v758_v47, 0.0  ;;  %v838_v52 = vmax.f32 %v774_v48, 0.0  ;;  %v722_v53 = vmul.f32 %v1295_v5, %v610_v49  ;;  %v738_v54 = vmul.f32 %v1295_v5, %v658_v50 }
  0xeb   : > { %887 = vst.msk [vmem:[%s1311_s12 + $0x50] sm:$0xff] %vm876_vm2, %v822_v51  ;;  %v790_v55 = vadd.f32 %v1300_v6, %v722_v53  ;;  %v806_v56 = vadd.f32 %v1300_v6, %v738_v54 }
  0xec   : > { %903 = vst.msk [vmem:[%s1311_s12 + $0xd0] sm:$0xff] %vm876_vm2, %v838_v52  ;;  %v517_v57 = vpop.f32.mrf.mxu0  ;;  %v565_v58 = vpop.f32.mrf.mxu1 }
  0xed   : > { %v854_v59 = vmax.f32 %v790_v55, 0.0  ;;  %v870_v60 = vmax.f32 %v806_v56, 0.0  ;;  %v691_v61 = vmul.f32 %v1295_v5, %v517_v57  ;;  %v707_v62 = vmul.f32 %v1295_v5, %v565_v58 }
  0xef   : > { %919 = vst.msk [vmem:[%s1311_s12 + $0x150] sm:$0xff] %vm876_vm2, %v854_v59  ;;  %v759_v63 = vadd.f32 %v1300_v6, %v691_v61  ;;  %v775_v0 = vadd.f32 %v1300_v6, %v707_v62 }
  0xf0   : > { %935 = vst.msk [vmem:[%s1311_s12 + $0x1d0] sm:$0xff] %vm876_vm2, %v870_v60  ;;  %v613_v1 = vpop.f32.mrf.mxu2  ;;  %v661_v2 = vpop.f32.mrf.mxu3 }
  0xf1   : > { %v823_v3 = vmax.f32 %v759_v63, 0.0  ;;  %v839_v4 = vmax.f32 %v775_v0, 0.0  ;;  %v723_v7 = vmul.f32 %v1295_v5, %v613_v1  ;;  %v739_v8 = vmul.f32 %v1295_v5, %v661_v2 }
  0xf3   : > { %888 = vst.msk [vmem:[%s1311_s12 + $0x58] sm:$0xff] %vm876_vm2, %v823_v3  ;;  %v791_v9 = vadd.f32 %v1300_v6, %v723_v7  ;;  %v807_v10 = vadd.f32 %v1300_v6, %v739_v8 }
  0xf4   : > { %904 = vst.msk [vmem:[%s1311_s12 + $0xd8] sm:$0xff] %vm876_vm2, %v839_v4  ;;  %v520_v11 = vpop.f32.mrf.mxu0  ;;  %v568_v12 = vpop.f32.mrf.mxu1 }
  0xf5   : > { %v855_v13 = vmax.f32 %v791_v9, 0.0  ;;  %v871_v14 = vmax.f32 %v807_v10, 0.0  ;;  %v692_v15 = vmul.f32 %v1295_v5, %v520_v11  ;;  %v708_v16 = vmul.f32 %v1295_v5, %v568_v12 }
  0xf7   : > { %920 = vst.msk [vmem:[%s1311_s12 + $0x158] sm:$0xff] %vm876_vm2, %v855_v13  ;;  %v760_v17 = vadd.f32 %v1300_v6, %v692_v15  ;;  %v776_v18 = vadd.f32 %v1300_v6, %v708_v16 }
  0xf8   : > { %936 = vst.msk [vmem:[%s1311_s12 + $0x1d8] sm:$0xff] %vm876_vm2, %v871_v14  ;;  %v616_v19 = vpop.f32.mrf.mxu2  ;;  %v664_v20 = vpop.f32.mrf.mxu3 }
  0xf9   : > { %v824_v21 = vmax.f32 %v760_v17, 0.0  ;;  %v840_v22 = vmax.f32 %v776_v18, 0.0  ;;  %v724_v23 = vmul.f32 %v1295_v5, %v616_v19  ;;  %v740_v24 = vmul.f32 %v1295_v5, %v664_v20 }
  0xfb   : > { %889 = vst.msk [vmem:[%s1311_s12 + $0x60] sm:$0xff] %vm876_vm2, %v824_v21  ;;  %v792_v25 = vadd.f32 %v1300_v6, %v724_v23  ;;  %v808_v26 = vadd.f32 %v1300_v6, %v740_v24 }
  0xfc   : > { %905 = vst.msk [vmem:[%s1311_s12 + $0xe0] sm:$0xff] %vm876_vm2, %v840_v22  ;;  %v523_v27 = vpop.f32.mrf.mxu0  ;;  %v571_v28 = vpop.f32.mrf.mxu1 }
  0xfd   : > { %v856_v29 = vmax.f32 %v792_v25, 0.0  ;;  %v872_v30 = vmax.f32 %v808_v26, 0.0  ;;  %v693_v31 = vmul.f32 %v1295_v5, %v523_v27  ;;  %v709_v32 = vmul.f32 %v1295_v5, %v571_v28 }
  0xff   : > { %921 = vst.msk [vmem:[%s1311_s12 + $0x160] sm:$0xff] %vm876_vm2, %v856_v29  ;;  %v761_v33 = vadd.f32 %v1300_v6, %v693_v31  ;;  %v777_v34 = vadd.f32 %v1300_v6, %v709_v32 }
 0x100   : > { %937 = vst.msk [vmem:[%s1311_s12 + $0x1e0] sm:$0xff] %vm876_vm2, %v872_v30  ;;  %v619_v35 = vpop.f32.mrf.mxu2  ;;  %v667_v36 = vpop.f32.mrf.mxu3 }
 0x101   : > { %v825_v37 = vmax.f32 %v761_v33, 0.0  ;;  %v841_v38 = vmax.f32 %v777_v34, 0.0  ;;  %v725_v39 = vmul.f32 %v1295_v5, %v619_v35  ;;  %v741_v40 = vmul.f32 %v1295_v5, %v667_v36 }
 0x103   : > { %890 = vst.msk [vmem:[%s1311_s12 + $0x68] sm:$0xff] %vm876_vm2, %v825_v37  ;;  %v793_v41 = vadd.f32 %v1300_v6, %v725_v39  ;;  %v809_v42 = vadd.f32 %v1300_v6, %v741_v40 }
 0x104   : > { %906 = vst.msk [vmem:[%s1311_s12 + $0xe8] sm:$0xff] %vm876_vm2, %v841_v38  ;;  %v526_v43 = vpop.f32.mrf.mxu0  ;;  %v574_v44 = vpop.f32.mrf.mxu1 }
 0x105   : > { %v857_v45 = vmax.f32 %v793_v41, 0.0  ;;  %v873_v46 = vmax.f32 %v809_v42, 0.0  ;;  %v694_v47 = vmul.f32 %v1295_v5, %v526_v43  ;;  %v710_v48 = vmul.f32 %v1295_v5, %v574_v44 }
 0x107   : > { %922 = vst.msk [vmem:[%s1311_s12 + $0x168] sm:$0xff] %vm876_vm2, %v857_v45  ;;  %v762_v49 = vadd.f32 %v1300_v6, %v694_v47  ;;  %v778_v50 = vadd.f32 %v1300_v6, %v710_v48 }
 0x108   : > { %938 = vst.msk [vmem:[%s1311_s12 + $0x1e8] sm:$0xff] %vm876_vm2, %v873_v46  ;;  %v622_v51 = vpop.f32.mrf.mxu2  ;;  %v670_v52 = vpop.f32.mrf.mxu3 }
 0x109   : > { %v826_v53 = vmax.f32 %v762_v49, 0.0  ;;  %v842_v54 = vmax.f32 %v778_v50, 0.0  ;;  %v726_v55 = vmul.f32 %v1295_v5, %v622_v51  ;;  %v742_v56 = vmul.f32 %v1295_v5, %v670_v52 }
 0x10b   : > { %891 = vst.msk [vmem:[%s1311_s12 + $0x70] sm:$0xff] %vm876_vm2, %v826_v53  ;;  %v794_v57 = vadd.f32 %v1300_v6, %v726_v55  ;;  %v810_v58 = vadd.f32 %v1300_v6, %v742_v56 }
 0x10c   : > { %907 = vst.msk [vmem:[%s1311_s12 + $0xf0] sm:$0xff] %vm876_vm2, %v842_v54  ;;  %v529_v59 = vpop.f32.mrf.mxu0  ;;  %v577_v60 = vpop.f32.mrf.mxu1 }
 0x10d   : > { %v858_v61 = vmax.f32 %v794_v57, 0.0  ;;  %v874_v62 = vmax.f32 %v810_v58, 0.0  ;;  %v695_v63 = vmul.f32 %v1295_v5, %v529_v59  ;;  %v711_v0 = vmul.f32 %v1295_v5, %v577_v60 }
 0x10f   : > { %923 = vst.msk [vmem:[%s1311_s12 + $0x170] sm:$0xff] %vm876_vm2, %v858_v61  ;;  %v763_v1 = vadd.f32 %v1300_v6, %v695_v63  ;;  %v779_v2 = vadd.f32 %v1300_v6, %v711_v0 }
 0x110   : > { %939 = vst.msk [vmem:[%s1311_s12 + $0x1f0] sm:$0xff] %vm876_vm2, %v874_v62  ;;  %v625_v3 = vpop.f32.mrf.mxu2  ;;  %v673_v4 = vpop.f32.mrf.mxu3 }
 0x111   : > { %v827_v7 = vmax.f32 %v763_v1, 0.0  ;;  %v843_v8 = vmax.f32 %v779_v2, 0.0  ;;  %v727_v9 = vmul.f32 %v1295_v5, %v625_v3  ;;  %v743_v10 = vmul.f32 %v1295_v5, %v673_v4 }
 0x113   : > { %892 = vst.msk [vmem:[%s1311_s12 + $0x78] sm:$0xff] %vm876_vm2, %v827_v7  ;;  %v795_v11 = vadd.f32 %v1300_v6, %v727_v9  ;;  %v811_v12 = vadd.f32 %v1300_v6, %v743_v10 }
 0x114   : > { %908 = vst.msk [vmem:[%s1311_s12 + $0xf8] sm:$0xff] %vm876_vm2, %v843_v8 }
 0x115   : > { %v859_v13 = vmax.f32 %v795_v11, 0.0  ;;  %v875_v14 = vmax.f32 %v811_v12, 0.0 }
 0x117   : > { %924 = vst.msk [vmem:[%s1311_s12 + $0x178] sm:$0xff] %vm876_vm2, %v859_v13 }
 0x118   : > { %940 = vst.msk [vmem:[%s1311_s12 + $0x1f8] sm:$0xff] %vm876_vm2, %v875_v14 }
 0x119 PF: > { %s14_s15 = sadd.s32 1, %s1104_s15  }
 0x11a   : > { %p11_p4 = scmp.ge.s32.totalorder %s14_s15, 4  }
 0x11c   :  { %13 = sbr.rel (!%p11_p4) target bundleno = 1 (0x1), region = 66 }

</bundles_post_ra>
